<compile_context>
chip_gen: v6e
topology: v6e:2x2x1
jax: 0.10.0
libtpu: 0.0.40
codegen_flags: <defaults>
</compile_context>

<pallas_src>
import functools

import jax
import jax.numpy as jnp
from jax.experimental import pallas as pl
from jax.experimental.pallas import tpu as pltpu

LANE = 128      # lane width: node dim and all feature dims padded to multiples of this
SUBLANE = 8     # sublane width: graph (pool-output) dim padded to a multiple of this


def _round_up(v, m):
    return -(-v // m) * m


def _pad2d(arr, rows, cols):
    r, c = arr.shape
    return jnp.pad(arr, ((0, rows - r), (0, cols - c)))


def _vmem_limit(block_bytes):
    # 2x headroom for pipeline double-buffers / Mosaic scratch; never ask below
    # 32 MiB or above 100 MiB.
    # TODO(synk): on v7x (64 MiB VMEM/TC) very large graphs additionally need a
    # K (node) axis tile on the A @ (XW) matmul; not required at these sizes.
    return int(min(max(int(block_bytes) * 2, 32 * 1024 * 1024), 100 * 1024 * 1024))


# ----------------------------------------------------------------------------
# Kernel 1: XW = H @ W   (row-tiled over nodes, weights resident)
# ----------------------------------------------------------------------------
def _xw_kernel(h_ref, w_ref, o_ref):
    o_ref[...] = jnp.dot(h_ref[...], w_ref[...],
                         preferred_element_type=jnp.float32).astype(jnp.bfloat16)


def _xw_matmul(h, w, tm):
    n_pad, f_in = h.shape
    f_out = w.shape[1]
    block_bytes = (2 * tm * f_in * 2        # H row tile (double buffered, bf16)
                   + f_in * f_out * 2       # W resident
                   + 2 * tm * f_out * 2)    # out tile (double buffered, bf16)
    return pl.pallas_call(
        _xw_kernel,
        out_shape=jax.ShapeDtypeStruct((n_pad, f_out), jnp.bfloat16),
        grid=(n_pad // tm,),
        in_specs=[pl.BlockSpec((tm, f_in), lambda i: (i, 0)),
                  pl.BlockSpec((f_in, f_out), lambda i: (0, 0))],
        out_specs=pl.BlockSpec((tm, f_out), lambda i: (i, 0)),
        compiler_params=pltpu.CompilerParams(
            dimension_semantics=("parallel",),
            vmem_limit_bytes=_vmem_limit(block_bytes)),
    )(h, w)


# ----------------------------------------------------------------------------
# Kernel 2: H_out = relu(A_tile @ XW + b) * scale + shift   (row-tiled over A)
# ----------------------------------------------------------------------------
def _gcn_layer_kernel(a_ref, xw_ref, b_ref, sc_ref, sh_ref, o_ref):
    # A row-tile is (re)loaded per grid step; XW stays resident (constant index map).
    ah = jnp.dot(a_ref[...], xw_ref[...], preferred_element_type=jnp.float32)
    h = jnp.maximum(ah + b_ref[...], 0.0) * sc_ref[...] + sh_ref[...]
    o_ref[...] = h.astype(jnp.bfloat16)


def _gcn_layer(a_hat, xw, b, scale, shift, tm):
    n_pad = a_hat.shape[0]
    f_out = xw.shape[1]
    block_bytes = (2 * tm * n_pad * 2       # A row tile (double buffered, bf16)
                   + n_pad * f_out * 2      # XW resident (bf16)
                   + 3 * f_out * 4          # b / scale / shift
                   + 2 * tm * f_out * 2)    # out tile (double buffered, bf16)
    cost = pl.CostEstimate(
        flops=2 * n_pad * n_pad * f_out, transcendentals=0,
        bytes_accessed=n_pad * n_pad * 2 + 2 * n_pad * f_out * 2 + 3 * f_out * 4)
    return pl.pallas_call(
        _gcn_layer_kernel,
        out_shape=jax.ShapeDtypeStruct((n_pad, f_out), jnp.bfloat16),
        grid=(n_pad // tm,),
        in_specs=[pl.BlockSpec((tm, n_pad), lambda i: (i, 0)),
                  pl.BlockSpec((n_pad, f_out), lambda i: (0, 0)),
                  pl.BlockSpec((1, f_out), lambda i: (0, 0)),
                  pl.BlockSpec((1, f_out), lambda i: (0, 0)),
                  pl.BlockSpec((1, f_out), lambda i: (0, 0))],
        out_specs=pl.BlockSpec((tm, f_out), lambda i: (i, 0)),
        compiler_params=pltpu.CompilerParams(
            dimension_semantics=("parallel",),
            vmem_limit_bytes=_vmem_limit(block_bytes)),
        cost_estimate=cost,
    )(a_hat, xw, b, scale, shift)


# ----------------------------------------------------------------------------
# Kernel 3: global mean pool  out = P @ H  (reduction over node row tiles)
# ----------------------------------------------------------------------------
def _pool_kernel(p_ref, h_ref, o_ref, acc_ref):
    @pl.when(pl.program_id(0) == 0)
    def _():
        acc_ref[...] = jnp.zeros_like(acc_ref)

    acc_ref[...] += jnp.dot(p_ref[...], h_ref[...],
                            preferred_element_type=jnp.float32)

    @pl.when(pl.program_id(0) == pl.num_programs(0) - 1)
    def _():
        o_ref[...] = acc_ref[...]


def _mean_pool(pool_p, h, tm):
    g_pad = pool_p.shape[0]
    n_pad, f_out = h.shape
    block_bytes = (2 * g_pad * tm * 2       # P column tile (bf16)
                   + 2 * tm * f_out * 2     # H row tile (bf16)
                   + 2 * g_pad * f_out * 4  # out + accumulator (f32)
                   + g_pad * f_out * 4)
    return pl.pallas_call(
        _pool_kernel,
        out_shape=jax.ShapeDtypeStruct((g_pad, f_out), jnp.float32),
        grid=(n_pad // tm,),
        in_specs=[pl.BlockSpec((g_pad, tm), lambda k: (0, k)),
                  pl.BlockSpec((tm, f_out), lambda k: (k, 0))],
        out_specs=pl.BlockSpec((g_pad, f_out), lambda k: (0, 0)),
        scratch_shapes=[pltpu.VMEM((g_pad, f_out), jnp.float32)],
        compiler_params=pltpu.CompilerParams(
            dimension_semantics=("arbitrary",),
            vmem_limit_bytes=_vmem_limit(block_bytes)),
    )(pool_p, h)


# ----------------------------------------------------------------------------
# Graph preprocessing (built ONCE, outside the jitted forward)
# ----------------------------------------------------------------------------
def normalized_adjacency(edge_index, num_nodes):
    """A_hat = D^{-1/2} (A + I) D^{-1/2}  (PyG GCNConv default normalization)."""
    src, dst = edge_index[0], edge_index[1]
    a = jnp.zeros((num_nodes, num_nodes), jnp.float32).at[dst, src].add(1.0)
    a = a + jnp.eye(num_nodes, dtype=jnp.float32)   # self loops
    deg = a.sum(axis=1)
    d_inv_sqrt = jax.lax.rsqrt(deg)
    return a * d_inv_sqrt[:, None] * d_inv_sqrt[None, :]


def pooling_matrix(batch, num_graphs):
    """P[g, n] = 1/|graph g| if node n belongs to graph g (global_mean_pool)."""
    onehot = (batch[None, :] == jnp.arange(num_graphs)[:, None]).astype(jnp.float32)
    counts = onehot.sum(axis=1, keepdims=True)
    return onehot / counts


def pad_graph_operators(a_hat, pool):
    """Pad node dim to 128 (lane-dense), graph dim to 8; cast operators to bf16.

    Padded rows/columns of A_hat and P are exactly zero, so padded node rows
    (which become relu(b)*scale+shift != 0 after each layer) never leak into
    real outputs.
    """
    num_nodes = a_hat.shape[0]
    num_graphs = pool.shape[0]
    n_pad = _round_up(num_nodes, LANE)
    g_pad = _round_up(num_graphs, SUBLANE)
    a_hat_p = _pad2d(a_hat, n_pad, n_pad).astype(jnp.bfloat16)
    pool_p = _pad2d(pool, g_pad, n_pad).astype(jnp.bfloat16)
    return a_hat_p, pool_p, n_pad, g_pad


# ----------------------------------------------------------------------------
# Parameters: deterministic init + (fold BN, pad to lane-dense, cast W to bf16)
# ----------------------------------------------------------------------------
def init_params(key, input_dim, hidden_dim, num_hidden, output_dim):
    """num_hidden GCN blocks: 1 embedding + (num_hidden-2) hidden + 1 output."""
    dims = [input_dim] + [hidden_dim] * (num_hidden - 1) + [output_dim]
    params = []
    for i in range(len(dims) - 1):
        d_in, d_out = dims[i], dims[i + 1]
        key, wk, gk, bk, mk, vk = jax.random.split(key, 6)
        bound = (6.0 / (d_in + d_out)) ** 0.5            # glorot uniform (GCNConv init)
        w = jax.random.uniform(wk, (d_in, d_out), jnp.float32, -bound, bound)
        b = jnp.zeros((1, d_out), jnp.float32)           # GCNConv bias init = zeros
        # Non-trivial eval-mode BN stats so the folded scale/shift path is exercised.
        gamma = 1.0 + 0.1 * jax.random.normal(gk, (1, d_out), jnp.float32)
        beta = 0.1 * jax.random.normal(bk, (1, d_out), jnp.float32)
        run_mean = 0.1 * jax.random.normal(mk, (1, d_out), jnp.float32)
        run_var = 1.0 + 0.1 * jax.random.uniform(vk, (1, d_out), jnp.float32)
        params.append((w, b, gamma, beta, run_mean, run_var))
    return params


def prepare_fused_params(params, eps=1e-5):
    """Fold BN(eval) into (scale, shift), pad feature dims to 128, cast W to bf16.

    Padded columns get w=0, b=0, scale=0, shift=0 so padded feature lanes are
    exactly zero through every layer.
    """
    flat = []
    for (w, b, gamma, beta, mean, var) in params:
        scale = gamma * jax.lax.rsqrt(var + eps)
        shift = beta - mean * scale
        d_in, d_out = w.shape
        d_in_p = _round_up(d_in, LANE)
        d_out_p = _round_up(d_out, LANE)
        flat.append(_pad2d(w, d_in_p, d_out_p).astype(jnp.bfloat16))
        flat.append(_pad2d(b, 1, d_out_p))
        flat.append(_pad2d(scale, 1, d_out_p))
        flat.append(_pad2d(shift, 1, d_out_p))
    return tuple(flat)


# ----------------------------------------------------------------------------
# Forward
# ----------------------------------------------------------------------------
@jax.jit
def drug_gcn_forward(a_hat_p, pool_p, x_p, flat_params):
    n_pad = a_hat_p.shape[0]
    # 256-row tiles when possible (v6e/v7x 2x256^2 MXU), else 128 (v5e 4x128^2).
    row_tile = 256 if n_pad % 256 == 0 else 128
    num_layers = len(flat_params) // 4
    h = x_p
    for l in range(num_layers):
        w, b, sc, sh = flat_params[4 * l:4 * l + 4]
        xw = _xw_matmul(h, w, row_tile)
        h = _gcn_layer(a_hat_p, xw, b, sc, sh, row_tile)
    return _mean_pool(pool_p, h, row_tile)


def reference_forward(a_hat, pool, x, params, eps=1e-5):
    """Pure-JAX f32 reference of the PyTorch forward (eval mode)."""
    h = x
    for (w, b, gamma, beta, mean, var) in params:
        z = a_hat @ (h @ w) + b
        r = jnp.maximum(z, 0.0)
        h = gamma * (r - mean) * jax.lax.rsqrt(var + eps) + beta
    return pool @ h


# ----------------------------------------------------------------------------
# Main
# ----------------------------------------------------------------------------
if __name__ == "__main__":
    # Small shapes consistent with the module's forward:
    #   x: [num_nodes, input_dim], edge_index: [2, num_edges], batch: [num_nodes]
    num_graphs = 2
    nodes_per_graph = 16
    num_nodes = num_graphs * nodes_per_graph
    input_dim, hidden_dim, num_hidden, output_dim = 16, 32, 3, 16

    key = jax.random.PRNGKey(0)
    key, xkey = jax.random.split(key)
    x = jax.random.normal(xkey, (num_nodes, input_dim), jnp.float32)

    # Undirected ring graph inside each molecule (deterministic edge_index).
    src_list, dst_list = [], []
    for g in range(num_graphs):
        off = g * nodes_per_graph
        for i in range(nodes_per_graph):
            a_n = off + i
            b_n = off + (i + 1) % nodes_per_graph
            src_list += [a_n, b_n]
            dst_list += [b_n, a_n]
    edge_index = jnp.array([src_list, dst_list], dtype=jnp.int32)   # [2, 64]
    batch = jnp.repeat(jnp.arange(num_graphs, dtype=jnp.int32), nodes_per_graph)

    # Graph operators and fused/padded params are built ONCE, outside the jit.
    a_hat = normalized_adjacency(edge_index, num_nodes)
    pool = pooling_matrix(batch, num_graphs)
    a_hat_p, pool_p, n_pad, g_pad = pad_graph_operators(a_hat, pool)

    params = init_params(key, input_dim, hidden_dim, num_hidden, output_dim)
    flat_params = prepare_fused_params(params)

    # x: cast to bf16 first, then pad, outside the jitted forward.
    f_in_pad = flat_params[0].shape[0]
    x_p = _pad2d(x.astype(jnp.bfloat16), n_pad, f_in_pad)

    out_p = drug_gcn_forward(a_hat_p, pool_p, x_p, flat_params)
    jax.block_until_ready(out_p)

    emb = out_p[:num_graphs, :output_dim]
    assert emb.shape == (num_graphs, output_dim)

    # Padding invariants: padded graph rows and padded feature lanes are zero.
    assert float(jnp.max(jnp.abs(out_p[num_graphs:, :]))) <= 1e-6
    assert float(jnp.max(jnp.abs(out_p[:, output_dim:]))) <= 1e-6

    # Parity vs f32 reference (bf16 MXU inputs -> loose tolerance).
    ref = reference_forward(a_hat, pool, x, params)
    max_err = float(jnp.max(jnp.abs(emb - ref)))
    assert max_err < 0.1, f"parity vs f32 reference failed: max_err={max_err}"

    print("KERNEL_OK")
</pallas_src>

<mosaic_0001>
module attributes {stable_mosaic.version = 11 : i64} {
  func.func @_xw_kernel(%arg0: i32, %arg1: memref<128x128xbf16, #tpu.memory_space<vmem>>, %arg2: memref<128x128xbf16, #tpu.memory_space<vmem>>, %arg3: memref<128x128xbf16, #tpu.memory_space<vmem>>) attributes {dimension_semantics = [#tpu.dimension_semantics<parallel>], iteration_bounds = array<i64: 1>, scalar_prefetch = 0 : i64, scratch_operands = 0 : i64, tpu.core_type = #tpu.core_type<tc>, window_params = [{transform_indices = @transform_0, window_bounds = array<i64: 128, 128>}, {pipeline_mode = #tpu.pipeline_mode<synchronous>, transform_indices = @transform_1, window_bounds = array<i64: 128, 128>}, {transform_indices = @transform_2, window_bounds = array<i64: 128, 128>}]} {
    %c0 = arith.constant 0 : index
    %c0_0 = arith.constant 0 : index
    %0 = vector.load %arg1[%c0, %c0_0] : memref<128x128xbf16, #tpu.memory_space<vmem>>, vector<128x128xbf16>
    %c0_1 = arith.constant 0 : index
    %c0_2 = arith.constant 0 : index
    %1 = vector.load %arg2[%c0_1, %c0_2] : memref<128x128xbf16, #tpu.memory_space<vmem>>, vector<128x128xbf16>
    %cst = arith.constant dense<0.000000e+00> : vector<128x128xf32>
    %2 = tpu.matmul %0, %1, %cst {dimension_numbers = #tpu.dot_dimension_numbers<[1], [0], [0], [1], [0, 0, 1, 1], [], []>} : vector<128x128xbf16>, vector<128x128xbf16>, vector<128x128xf32> -> vector<128x128xf32>
    %3 = arith.truncf %2 : vector<128x128xf32> to vector<128x128xbf16>
    %c0_3 = arith.constant 0 : index
    %c0_4 = arith.constant 0 : index
    %4 = vector.load %arg3[%c0_3, %c0_4] : memref<128x128xbf16, #tpu.memory_space<vmem>>, vector<128x128xbf16>
    tpu.vector_store %arg3[%c0_3, %c0_4], %3 {strides = array<i32>} : memref<128x128xbf16, #tpu.memory_space<vmem>>, vector<128x128xbf16>,
    return
  }
  func.func @transform_0(%arg0: i32) -> (i32, i32) {
    %c0_i32 = arith.constant 0 : i32
    %c0_i32_0 = arith.constant 0 : i32
    return %arg0, %c0_i32 : i32, i32
  }
  func.func @transform_1(%arg0: i32) -> (i32, i32) {
    %c0_i32 = arith.constant 0 : i32
    %c0_i32_0 = arith.constant 0 : i32
    %c0_i32_1 = arith.constant 0 : i32
    return %c0_i32, %c0_i32_0 : i32, i32
  }
  func.func @transform_2(%arg0: i32) -> (i32, i32) {
    %c0_i32 = arith.constant 0 : i32
    %c0_i32_0 = arith.constant 0 : i32
    return %arg0, %c0_i32 : i32, i32
  }
}

module attributes {stable_mosaic.version = 11 : i64} {
  func.func @_pool_kernel(%arg0: i32, %arg1: memref<8x128xbf16, #tpu.memory_space<vmem>>, %arg2: memref<128x128xbf16, #tpu.memory_space<vmem>>, %arg3: memref<8x128xf32, #tpu.memory_space<vmem>>, %arg4: memref<8x128xf32, #tpu.memory_space<vmem>>) attributes {dimension_semantics = [#tpu.dimension_semantics<arbitrary>], iteration_bounds = array<i64: 1>, scalar_prefetch = 0 : i64, scratch_operands = 1 : i64, tpu.core_type = #tpu.core_type<tc>, window_params = [{transform_indices = @transform_0, window_bounds = array<i64: 8, 128>}, {transform_indices = @transform_1, window_bounds = array<i64: 128, 128>}, {pipeline_mode = #tpu.pipeline_mode<synchronous>, transform_indices = @transform_2, window_bounds = array<i64: 8, 128>}]} {
    %c0_i32 = arith.constant 0 : i32
    %0 = arith.cmpi eq, %arg0, %c0_i32 : i32
    %1 = arith.extui %0 : i1 to i32
    %c0_i32_0 = arith.constant 0 : i32
    %2 = arith.cmpi ne, %1, %c0_i32_0 : i32
    scf.if %2 {
      %cst_10 = arith.constant 0.000000e+00 : f32
      %12 = vector.broadcast %cst_10 : f32 to vector<8x128xf32>
      %c0_11 = arith.constant 0 : index
      %c0_12 = arith.constant 0 : index
      %13 = vector.load %arg4[%c0_11, %c0_12] : memref<8x128xf32, #tpu.memory_space<vmem>>, vector<8x128xf32>
      tpu.vector_store %arg4[%c0_11, %c0_12], %12 {strides = array<i32>} : memref<8x128xf32, #tpu.memory_space<vmem>>, vector<8x128xf32>,
    } else {
    }
    %c0 = arith.constant 0 : index
    %c0_1 = arith.constant 0 : index
    %3 = vector.load %arg4[%c0, %c0_1] : memref<8x128xf32, #tpu.memory_space<vmem>>, vector<8x128xf32>
    %c0_2 = arith.constant 0 : index
    %c0_3 = arith.constant 0 : index
    %4 = vector.load %arg1[%c0_2, %c0_3] : memref<8x128xbf16, #tpu.memory_space<vmem>>, vector<8x128xbf16>
    %c0_4 = arith.constant 0 : index
    %c0_5 = arith.constant 0 : index
    %5 = vector.load %arg2[%c0_4, %c0_5] : memref<128x128xbf16, #tpu.memory_space<vmem>>, vector<128x128xbf16>
    %cst = arith.constant dense<0.000000e+00> : vector<8x128xf32>
    %6 = tpu.matmul %4, %5, %cst {dimension_numbers = #tpu.dot_dimension_numbers<[1], [0], [0], [1], [0, 0, 1, 1], [], []>} : vector<8x128xbf16>, vector<128x128xbf16>, vector<8x128xf32> -> vector<8x128xf32>
    %7 = arith.addf %3, %6 : vector<8x128xf32>
    %c0_6 = arith.constant 0 : index
    %c0_7 = arith.constant 0 : index
    %8 = vector.load %arg4[%c0_6, %c0_7] : memref<8x128xf32, #tpu.memory_space<vmem>>, vector<8x128xf32>
    tpu.vector_store %arg4[%c0_6, %c0_7], %7 {strides = array<i32>} : memref<8x128xf32, #tpu.memory_space<vmem>>, vector<8x128xf32>,
    %c0_i32_8 = arith.constant 0 : i32
    %9 = arith.cmpi eq, %arg0, %c0_i32_8 : i32
    %10 = arith.extui %9 : i1 to i32
    %c0_i32_9 = arith.constant 0 : i32
    %11 = arith.cmpi ne, %10, %c0_i32_9 : i32
    scf.if %11 {
      %c0_10 = arith.constant 0 : index
      %c0_11 = arith.constant 0 : index
      %12 = vector.load %arg4[%c0_10, %c0_11] : memref<8x128xf32, #tpu.memory_space<vmem>>, vector<8x128xf32>
      %c0_12 = arith.constant 0 : index
      %c0_13 = arith.constant 0 : index
      %13 = vector.load %arg3[%c0_12, %c0_13] : memref<8x128xf32, #tpu.memory_space<vmem>>, vector<8x128xf32>
      tpu.vector_store %arg3[%c0_12, %c0_13], %12 {strides = array<i32>} : memref<8x128xf32, #tpu.memory_space<vmem>>, vector<8x128xf32>,
    } else {
    }
    return
  }
  func.func @transform_0(%arg0: i32) -> (i32, i32) {
    %c0_i32 = arith.constant 0 : i32
    %c0_i32_0 = arith.constant 0 : i32
    return %c0_i32, %arg0 : i32, i32
  }
  func.func @transform_1(%arg0: i32) -> (i32, i32) {
    %c0_i32 = arith.constant 0 : i32
    %c0_i32_0 = arith.constant 0 : i32
    return %arg0, %c0_i32 : i32, i32
  }
  func.func @transform_2(%arg0: i32) -> (i32, i32) {
    %c0_i32 = arith.constant 0 : i32
    %c0_i32_0 = arith.constant 0 : i32
    %c0_i32_1 = arith.constant 0 : i32
    return %c0_i32, %c0_i32_0 : i32, i32
  }
}

module attributes {stable_mosaic.version = 11 : i64} {
  func.func @_gcn_layer_kernel(%arg0: i32, %arg1: memref<128x128xbf16, #tpu.memory_space<vmem>>, %arg2: memref<128x128xbf16, #tpu.memory_space<vmem>>, %arg3: memref<1x128xf32, #tpu.memory_space<vmem>>, %arg4: memref<1x128xf32, #tpu.memory_space<vmem>>, %arg5: memref<1x128xf32, #tpu.memory_space<vmem>>, %arg6: memref<128x128xbf16, #tpu.memory_space<vmem>>) attributes {dimension_semantics = [#tpu.dimension_semantics<parallel>], iteration_bounds = array<i64: 1>, scalar_prefetch = 0 : i64, scratch_operands = 0 : i64, tpu.core_type = #tpu.core_type<tc>, window_params = [{transform_indices = @transform_0, window_bounds = array<i64: 128, 128>}, {pipeline_mode = #tpu.pipeline_mode<synchronous>, transform_indices = @transform_1, window_bounds = array<i64: 128, 128>}, {pipeline_mode = #tpu.pipeline_mode<synchronous>, transform_indices = @transform_2, window_bounds = array<i64: 1, 128>}, {pipeline_mode = #tpu.pipeline_mode<synchronous>, transform_indices = @transform_3, window_bounds = array<i64: 1, 128>}, {pipeline_mode = #tpu.pipeline_mode<synchronous>, transform_indices = @transform_4, window_bounds = array<i64: 1, 128>}, {transform_indices = @transform_5, window_bounds = array<i64: 128, 128>}]} {
    %c0 = arith.constant 0 : index
    %c0_0 = arith.constant 0 : index
    %0 = vector.load %arg1[%c0, %c0_0] : memref<128x128xbf16, #tpu.memory_space<vmem>>, vector<128x128xbf16>
    %c0_1 = arith.constant 0 : index
    %c0_2 = arith.constant 0 : index
    %1 = vector.load %arg2[%c0_1, %c0_2] : memref<128x128xbf16, #tpu.memory_space<vmem>>, vector<128x128xbf16>
    %cst = arith.constant dense<0.000000e+00> : vector<128x128xf32>
    %2 = tpu.matmul %0, %1, %cst {dimension_numbers = #tpu.dot_dimension_numbers<[1], [0], [0], [1], [0, 0, 1, 1], [], []>} : vector<128x128xbf16>, vector<128x128xbf16>, vector<128x128xf32> -> vector<128x128xf32>
    %c0_3 = arith.constant 0 : index
    %c0_4 = arith.constant 0 : index
    %3 = vector.load %arg3[%c0_3, %c0_4] : memref<1x128xf32, #tpu.memory_space<vmem>>, vector<1x128xf32>
    %4 = vector.broadcast %3 : vector<1x128xf32> to vector<128x128xf32>
    %5 = arith.addf %2, %4 : vector<128x128xf32>
    %cst_5 = arith.constant 0.000000e+00 : f32
    %6 = vector.broadcast %cst_5 : f32 to vector<128x128xf32>
    %7 = arith.maximumf %5, %6 : vector<128x128xf32>
    %c0_6 = arith.constant 0 : index
    %c0_7 = arith.constant 0 : index
    %8 = vector.load %arg4[%c0_6, %c0_7] : memref<1x128xf32, #tpu.memory_space<vmem>>, vector<1x128xf32>
    %9 = vector.broadcast %8 : vector<1x128xf32> to vector<128x128xf32>
    %10 = arith.mulf %7, %9 : vector<128x128xf32>
    %c0_8 = arith.constant 0 : index
    %c0_9 = arith.constant 0 : index
    %11 = vector.load %arg5[%c0_8, %c0_9] : memref<1x128xf32, #tpu.memory_space<vmem>>, vector<1x128xf32>
    %12 = vector.broadcast %11 : vector<1x128xf32> to vector<128x128xf32>
    %13 = arith.addf %10, %12 : vector<128x128xf32>
    %14 = arith.truncf %13 : vector<128x128xf32> to vector<128x128xbf16>
    %c0_10 = arith.constant 0 : index
    %c0_11 = arith.constant 0 : index
    %15 = vector.load %arg6[%c0_10, %c0_11] : memref<128x128xbf16, #tpu.memory_space<vmem>>, vector<128x128xbf16>
    tpu.vector_store %arg6[%c0_10, %c0_11], %14 {strides = array<i32>} : memref<128x128xbf16, #tpu.memory_space<vmem>>, vector<128x128xbf16>,
    return
  }
  func.func @transform_0(%arg0: i32) -> (i32, i32) {
    %c0_i32 = arith.constant 0 : i32
    %c0_i32_0 = arith.constant 0 : i32
    return %arg0, %c0_i32 : i32, i32
  }
  func.func @transform_1(%arg0: i32) -> (i32, i32) {
    %c0_i32 = arith.constant 0 : i32
    %c0_i32_0 = arith.constant 0 : i32
    %c0_i32_1 = arith.constant 0 : i32
    return %c0_i32, %c0_i32_0 : i32, i32
  }
  func.func @transform_2(%arg0: i32) -> (i32, i32) {
    %c0_i32 = arith.constant 0 : i32
    %c0_i32_0 = arith.constant 0 : i32
    %c0_i32_1 = arith.constant 0 : i32
    return %c0_i32, %c0_i32_0 : i32, i32
  }
  func.func @transform_3(%arg0: i32) -> (i32, i32) {
    %c0_i32 = arith.constant 0 : i32
    %c0_i32_0 = arith.constant 0 : i32
    %c0_i32_1 = arith.constant 0 : i32
    return %c0_i32, %c0_i32_0 : i32, i32
  }
  func.func @transform_4(%arg0: i32) -> (i32, i32) {
    %c0_i32 = arith.constant 0 : i32
    %c0_i32_0 = arith.constant 0 : i32
    %c0_i32_1 = arith.constant 0 : i32
    return %c0_i32, %c0_i32_0 : i32, i32
  }
  func.func @transform_5(%arg0: i32) -> (i32, i32) {
    %c0_i32 = arith.constant 0 : i32
    %c0_i32_0 = arith.constant 0 : i32
    return %arg0, %c0_i32 : i32, i32
  }
}

module attributes {stable_mosaic.version = 11 : i64} {
  func.func @_xw_kernel(%arg0: i32, %arg1: memref<128x128xbf16, #tpu.memory_space<vmem>>, %arg2: memref<128x128xbf16, #tpu.memory_space<vmem>>, %arg3: memref<128x128xbf16, #tpu.memory_space<vmem>>) attributes {dimension_semantics = [#tpu.dimension_semantics<parallel>], iteration_bounds = array<i64: 1>, scalar_prefetch = 0 : i64, scratch_operands = 0 : i64, tpu.core_type = #tpu.core_type<tc>, window_params = [{transform_indices = @transform_0, window_bounds = array<i64: 128, 128>}, {pipeline_mode = #tpu.pipeline_mode<synchronous>, transform_indices = @transform_1, window_bounds = array<i64: 128, 128>}, {transform_indices = @transform_2, window_bounds = array<i64: 128, 128>}]} {
    %c0 = arith.constant 0 : index
    %c0_0 = arith.constant 0 : index
    %0 = vector.load %arg1[%c0, %c0_0] : memref<128x128xbf16, #tpu.memory_space<vmem>>, vector<128x128xbf16>
    %c0_1 = arith.constant 0 : index
    %c0_2 = arith.constant 0 : index
    %1 = vector.load %arg2[%c0_1, %c0_2] : memref<128x128xbf16, #tpu.memory_space<vmem>>, vector<128x128xbf16>
    %cst = arith.constant dense<0.000000e+00> : vector<128x128xf32>
    %2 = tpu.matmul %0, %1, %cst {dimension_numbers = #tpu.dot_dimension_numbers<[1], [0], [0], [1], [0, 0, 1, 1], [], []>} : vector<128x128xbf16>, vector<128x128xbf16>, vector<128x128xf32> -> vector<128x128xf32>
    %3 = arith.truncf %2 : vector<128x128xf32> to vector<128x128xbf16>
    %c0_3 = arith.constant 0 : index
    %c0_4 = arith.constant 0 : index
    %4 = vector.load %arg3[%c0_3, %c0_4] : memref<128x128xbf16, #tpu.memory_space<vmem>>, vector<128x128xbf16>
    tpu.vector_store %arg3[%c0_3, %c0_4], %3 {strides = array<i32>} : memref<128x128xbf16, #tpu.memory_space<vmem>>, vector<128x128xbf16>,
    return
  }
  func.func @transform_0(%arg0: i32) -> (i32, i32) {
    %c0_i32 = arith.constant 0 : i32
    %c0_i32_0 = arith.constant 0 : i32
    return %arg0, %c0_i32 : i32, i32
  }
  func.func @transform_1(%arg0: i32) -> (i32, i32) {
    %c0_i32 = arith.constant 0 : i32
    %c0_i32_0 = arith.constant 0 : i32
    %c0_i32_1 = arith.constant 0 : i32
    return %c0_i32, %c0_i32_0 : i32, i32
  }
  func.func @transform_2(%arg0: i32) -> (i32, i32) {
    %c0_i32 = arith.constant 0 : i32
    %c0_i32_0 = arith.constant 0 : i32
    return %arg0, %c0_i32 : i32, i32
  }
}

</mosaic_0001>

<bundles_post_ra>
// kernel: drug_gcn_forward.13
= control target key start
LH: loop header
LB: loop body
LE: loop exit
PB: predicated region body
PF: predicated region fallthrough
CT: control target
= control target key end

     0   :  { %v215_v1 = vmov 0.0   ;;  %vm216_vm0 = vmmov 0   ;;  %s263_s0 = inlined_call_operand.vmem [shape: bf16[8,128], index: 0, kind: input, shape index: {}]   ;;  %s264_s1 = inlined_call_operand.vmem [shape: bf16[128,128], index: 1, kind: input, shape index: {}]   ;;  %s265_s2 = inlined_call_operand.hbm [shape: f32[8,128], index: 2, kind: output, shape index: {}]  }
   0x1   :  { %v185_v0 = vld [vmem:[%s264_s1 + $0x38] sm:$0xff]   ;;  %162 = vmatprep.subr.bf16.mxu0 %v215_v1  ;;  %v186_v2 = vld [vmem:[%s264_s1 + $0x30] sm:$0xff]   ;;  %178 = vmatprep.mubr.msk.bf16.mxu0 %vm216_vm0, %v215_v1  ;;  %v187_v3 = vld [vmem:[%s264_s1 + $0x28] sm:$0xff]  }
   0x2   :  { %163 = vmatpush3.bf16.msra.mxu0 %v185_v0 }
   0x3   :  { %164 = vmatprep.subr.bf16.mxu0 %v215_v1 }
   0x6   :  { %165 = vmatpush3.bf16.msra.mxu0 %v186_v2 }
   0x7   :  { %166 = vmatprep.subr.bf16.mxu0 %v215_v1 }
   0x8   :  { %7 = vsyncpa [#allocation4], 0  ;;  %v188_v4 = vld [vmem:[%s264_s1 + $0x20] sm:$0xff]   ;;  %v189_v5 = vld [vmem:[%s264_s1 + $0x18] sm:$0xff]   ;;  %s217_s27 = smov [#allocation3]  }
   0x9   :  { %v190_v6 = vld [vmem:[%s264_s1 + $0x10] sm:$0xff]   ;;  %v191_v7 = vld [vmem:[%s264_s1 + $0x8] sm:$0xff]   ;;  %v192_v8 = vld [vmem:[%s264_s1] sm:$0xff]   ;;  %s137_s28 = sshll.u32 %s217_s27, 4  ;;  %s138_s28 = int_to_ptr.vmem [resolvable:$true] %s137_s28 }
   0xa   :  { %167 = vmatpush3.bf16.msra.mxu0 %v187_v3  ;;  %v19_v9 = vld [vmem:[%s263_s0] sm:$0xf]  ;;  %s193_s29 = scalar_lea.vmem %s138_s28, 128  ;;  %p198_p1 = scmp.lt.s32.totalorder %s138_s28, %s138_s28 }
   0xb   :  { %168 = vmatprep.subr.bf16.mxu0 %v215_v1  ;;  %p194_p0 = scmp.ne.s32.totalorder %s138_s28, %s193_s29  ;;  %p199_p2 = scmp.lt.s32.totalorder %s193_s29, %s193_s29 }
   0xd   :  { %p200_p3 = por %p199_p2, %p198_p1 }
   0xe   :  { %169 = vmatpush3.bf16.msra.mxu0 %v188_v4 }
   0xf   :  { %170 = vmatprep.subr.bf16.mxu0 %v215_v1  ;;  %p201_p4 = pnand %p200_p3, %p194_p0 }
  0x12   :  { %171 = vmatpush3.bf16.msra.mxu0 %v189_v5 }
  0x13   :  { %172 = vmatprep.subr.bf16.mxu0 %v215_v1 }
  0x16   :  { %173 = vmatpush3.bf16.msra.mxu0 %v190_v6 }
  0x17   :  { %174 = vmatprep.subr.bf16.mxu0 %v215_v1 }
  0x1a   :  { %175 = vmatpush3.bf16.msra.mxu0 %v191_v7 }
  0x1b   :  { %176 = vmatprep.subr.bf16.mxu0 %v215_v1 }
  0x1e   :  { %177 = vmatpush3.bf16.msra.mxu0 %v192_v8 }
  0x21   :  { %179 = vmatmul.mubr.bf16.vlgmr.msra.gmra.mxu0 %v19_v9 }
  0xe1   :  { %v118_v10 = vpop.f32.mrf.mxu0 }
  0xe2   :  { %130 = vst [vmem:[#allocation3] sm:$0xff] %v118_v10 }
  0xe3   :  { %v180_v11 = vpop.f32.mrf.mxu0 }
  0xe4   :  { %204 = shalt.err (!%p201_p4)
}
  0xe5   :  { %140 = dma.vmem_to_hbm [thread:$0]  %s138_s28, 128, %s265_s2, [#allocation4]   ;;  %v121_v12 = vpop.f32.mrf.mxu0 }
  0xe7   :  { %v181_v13 = vpop.f32.mrf.mxu0 }
  0xe8   :  { %213 = dma.done.wait [#allocation4], 128  }
  0xe9   :  { %214 = vsyncadd [#allocation4], 4294967168 }
  0xea   :  { %144 = vsyncpa [#allocation4], 1 }

// kernel: drug_gcn_forward.8
= control target key start
LH: loop header
LB: loop body
LE: loop exit
PB: predicated region body
PF: predicated region fallthrough
CT: control target
= control target key end

     0   :  { %s742_s1 = inlined_call_operand.vmem [shape: bf16[128,128], index: 1, kind: input, shape index: {}]   ;;  %s743_s0 = inlined_call_operand.vmem [shape: bf16[128,128], index: 0, kind: input, shape index: {}]   ;;  %s744_s2 = inlined_call_operand.vmem [shape: f32[1,128], index: 2, kind: input, shape index: {}]   ;;  %s745_s3 = inlined_call_operand.vmem [shape: f32[1,128], index: 3, kind: input, shape index: {}]   ;;  %s746_s4 = inlined_call_operand.vmem [shape: f32[1,128], index: 4, kind: input, shape index: {}]   ;;  %s747_s5 = inlined_call_operand.vmem [shape: bf16[128,128], index: 5, kind: output, shape index: {}]  }
   0x1   :  { %v561_v0 = vld [vmem:[%s742_s1 + $0x38] sm:$0xff]   ;;  %v562_v1 = vld [vmem:[%s742_s1 + $0x30] sm:$0xff]   ;;  %v563_v2 = vld [vmem:[%s742_s1 + $0x28] sm:$0xff]  }
   0x2   :  { %513 = vmatprep.subr.bf16.mxu0 %v561_v0  ;;  %545 = vmatprep.subr.bf16.mxu1 %v561_v0  ;;  %v564_v3 = vld [vmem:[%s742_s1 + $0x20] sm:$0xff]   ;;  %v565_v6 = vld [vmem:[%s742_s1 + $0x18] sm:$0xff]   ;;  %v566_v7 = vld [vmem:[%s742_s1 + $0x10] sm:$0xff]  }
   0x3   :  { %514 = vmatpush3.bf16.msra.mxu0 %v561_v0  ;;  %553 = vmatpush3.bf16.msra.mxu1 %v561_v0  ;;  %v569_v4 = vld [vmem:[%s743_s0] sm:$0xff]   ;;  %v567_v8 = vld [vmem:[%s742_s1 + $0x8] sm:$0xff]   ;;  %v573_v12 = vld [vmem:[%s743_s0 + $0x10] sm:$0xff]  }
   0x4   :  { %515 = vmatprep.subr.bf16.mxu0 %v562_v1  ;;  %546 = vmatprep.subr.bf16.mxu1 %v562_v1  ;;  %v570_v5 = vld [vmem:[%s743_s0 + $0x20] sm:$0xff]   ;;  %v571_v10 = vld [vmem:[%s743_s0 + $0x8] sm:$0xff]   ;;  %v574_v13 = vld [vmem:[%s743_s0 + $0x30] sm:$0xff]  }
   0x5   :  { %529 = vmatprep.mubr.bf16.mxu0 %v569_v4  ;;  %537 = vmatprep.mubr.bf16.mxu1 %v570_v5  ;;  %v568_v9 = vld [vmem:[%s742_s1] sm:$0xff]   ;;  %v572_v11 = vld [vmem:[%s743_s0 + $0x28] sm:$0xff]   ;;  %v575_v14 = vld [vmem:[%s743_s0 + $0x18] sm:$0xff]  }
   0x6   :  { %v576_v15 = vld [vmem:[%s743_s0 + $0x38] sm:$0xff]   ;;  %v658_v16 = vld [vmem:[%s744_s2] ss:$0 sm:$0xff] }
   0x7   :  { %516 = vmatpush3.bf16.msra.mxu0 %v562_v1  ;;  %554 = vmatpush3.bf16.msra.mxu1 %v562_v1  ;;  %v667_v27 = vld [vmem:[%s745_s3] ss:$0 sm:$0xff] }
   0x8   :  { %517 = vmatprep.subr.bf16.mxu0 %v563_v2  ;;  %547 = vmatprep.subr.bf16.mxu1 %v563_v2  ;;  %v676_v38 = vld [vmem:[%s746_s4] ss:$0 sm:$0xff] }
   0xb   :  { %518 = vmatpush3.bf16.msra.mxu0 %v563_v2  ;;  %555 = vmatpush3.bf16.msra.mxu1 %v563_v2 }
   0xc   :  { %519 = vmatprep.subr.bf16.mxu0 %v564_v3  ;;  %548 = vmatprep.subr.bf16.mxu1 %v564_v3 }
   0xf   :  { %520 = vmatpush3.bf16.msra.mxu0 %v564_v3  ;;  %556 = vmatpush3.bf16.msra.mxu1 %v564_v3 }
  0x10   :  { %521 = vmatprep.subr.bf16.mxu0 %v565_v6  ;;  %549 = vmatprep.subr.bf16.mxu1 %v565_v6 }
  0x13   :  { %522 = vmatpush3.bf16.msra.mxu0 %v565_v6  ;;  %557 = vmatpush3.bf16.msra.mxu1 %v565_v6 }
  0x14   :  { %523 = vmatprep.subr.bf16.mxu0 %v566_v7  ;;  %550 = vmatprep.subr.bf16.mxu1 %v566_v7 }
  0x17   :  { %524 = vmatpush3.bf16.msra.mxu0 %v566_v7  ;;  %558 = vmatpush3.bf16.msra.mxu1 %v566_v7 }
  0x18   :  { %525 = vmatprep.subr.bf16.mxu0 %v567_v8  ;;  %551 = vmatprep.subr.bf16.mxu1 %v567_v8 }
  0x1b   :  { %526 = vmatpush3.bf16.msra.mxu0 %v567_v8  ;;  %559 = vmatpush3.bf16.msra.mxu1 %v567_v8 }
  0x1c   :  { %527 = vmatprep.subr.bf16.mxu0 %v568_v9  ;;  %552 = vmatprep.subr.bf16.mxu1 %v568_v9 }
  0x1f   :  { %528 = vmatpush3.bf16.msra.mxu0 %v568_v9  ;;  %560 = vmatpush3.bf16.msra.mxu1 %v568_v9 }
  0x22   :  { %530 = vmatmul.mubr.bf16.vlgmr.msra.gmra.mxu0 %v571_v10  ;;  %538 = vmatmul.mubr.bf16.vlgmr.msra.gmra.mxu1 %v572_v11 }
  0x23   :  { %533 = vmatprep.mubr.bf16.mxu0 %v573_v12  ;;  %541 = vmatprep.mubr.bf16.mxu1 %v574_v13 }
  0x2a   :  { %534 = vmatmul.mubr.bf16.gmra.mxu0 %v575_v14  ;;  %542 = vmatmul.mubr.bf16.gmra.mxu1 %v576_v15 }
  0xe2   :  { %v531_v17 = vpop.f32.mrf.mxu0  ;;  %v539_v18 = vpop.f32.mrf.mxu1 }
  0xe3   :  { %v199_v19 = vadd.f32 %v531_v17, %v658_v16  ;;  %v231_v20 = vadd.f32 %v539_v18, %v658_v16 }
  0xe4   :  { %v190_v21 = vpop.f32.mrf.mxu0  ;;  %v222_v22 = vpop.f32.mrf.mxu1 }
  0xe5   :  { %v255_v23 = vmax.f32 %v199_v19, 0.0  ;;  %v263_v24 = vmax.f32 %v231_v20, 0.0  ;;  %v191_v25 = vadd.f32 %v658_v16, %v190_v21  ;;  %v223_v26 = vadd.f32 %v658_v16, %v222_v22 }
  0xe6   :  { %v532_v28 = vpop.f32.mrf.mxu0  ;;  %v540_v29 = vpop.f32.mrf.mxu1 }
  0xe7   :  { %v253_v30 = vmax.f32 %v191_v25, 0.0  ;;  %v261_v31 = vmax.f32 %v223_v26, 0.0  ;;  %v202_v32 = vadd.f32 %v532_v28, %v658_v16  ;;  %v234_v33 = vadd.f32 %v540_v29, %v658_v16 }
  0xe8   :  { %v193_v34 = vpop.f32.mrf.mxu0  ;;  %v225_v35 = vpop.f32.mrf.mxu1  ;;  %v278_v36 = vmul.f32 %v667_v27, %v255_v23  ;;  %v286_v37 = vmul.f32 %v667_v27, %v263_v24 }
  0xe9   :  { %v256_v39 = vmax.f32 %v202_v32, 0.0  ;;  %v264_v40 = vmax.f32 %v234_v33, 0.0  ;;  %v194_v41 = vadd.f32 %v658_v16, %v193_v34  ;;  %v226_v42 = vadd.f32 %v658_v16, %v225_v35 }
  0xea   :  { %v535_v43 = vpop.f32.mrf.mxu0  ;;  %v543_v44 = vpop.f32.mrf.mxu1  ;;  %v276_v45 = vmul.f32 %v667_v27, %v253_v30  ;;  %v284_v46 = vmul.f32 %v667_v27, %v261_v31  ;;  %v301_v55 = vadd.f32 %v676_v38, %v278_v36  ;;  %v309_v56 = vadd.f32 %v676_v38, %v286_v37 }
  0xeb   :  { %v215_v47 = vadd.f32 %v535_v43, %v658_v16  ;;  %v247_v48 = vadd.f32 %v543_v44, %v658_v16  ;;  %v279_v49 = vmul.f32 %v667_v27, %v256_v39  ;;  %v287_v50 = vmul.f32 %v667_v27, %v264_v40 }
  0xec   :  { %v254_v51 = vmax.f32 %v194_v41, 0.0  ;;  %v262_v52 = vmax.f32 %v226_v42, 0.0  ;;  %v206_v53 = vpop.f32.mrf.mxu0  ;;  %v238_v54 = vpop.f32.mrf.mxu1  ;;  %v299_v1 = vadd.f32 %v676_v38, %v276_v45  ;;  %v307_v2 = vadd.f32 %v676_v38, %v284_v46 }
  0xed   :  { %v207_v57 = vadd.f32 %v658_v16, %v206_v53  ;;  %v239_v58 = vadd.f32 %v658_v16, %v238_v54  ;;  %v302_v59 = vadd.f32 %v676_v38, %v279_v49  ;;  %v310_v60 = vadd.f32 %v676_v38, %v287_v50 }
  0xee   :  { %v277_v61 = vmul.f32 %v667_v27, %v254_v51  ;;  %v285_v62 = vmul.f32 %v667_v27, %v262_v52  ;;  %v536_v63 = vpop.f32.mrf.mxu0  ;;  %v544_v0 = vpop.f32.mrf.mxu1  ;;  %v259_v3 = vmax.f32 %v215_v47, 0.0  ;;  %v267_v4 = vmax.f32 %v247_v48, 0.0 }
  0xef   :  { %v458_v5 = vpack.c.bf16 %v302_v59, %v301_v55  ;;  %v478_v6 = vpack.c.bf16 %v310_v60, %v309_v56  ;;  %v257_v11 = vmax.f32 %v207_v57, 0.0  ;;  %v265_v12 = vmax.f32 %v239_v58, 0.0 }
  0xf0   :  { %v300_v7 = vadd.f32 %v676_v38, %v277_v61  ;;  %v308_v8 = vadd.f32 %v676_v38, %v285_v62  ;;  %v209_v9 = vpop.f32.mrf.mxu0  ;;  %v241_v10 = vpop.f32.mrf.mxu1  ;;  %v218_v15 = vadd.f32 %v536_v63, %v658_v16  ;;  %v250_v17 = vadd.f32 %v544_v0, %v658_v16 }
  0xf1   :  { %490 = vst [vmem:[%s747_s5 + $0x8] sm:$0xff] %v458_v5   ;;  %494 = vst [vmem:[%s747_s5 + $0x28] sm:$0xff] %v478_v6   ;;  %v210_v18 = vadd.f32 %v658_v16, %v209_v9  ;;  %v242_v19 = vadd.f32 %v658_v16, %v241_v10  ;;  %v282_v20 = vmul.f32 %v667_v27, %v259_v3 }
  0xf2   :  { %v453_v13 = vpack.c.bf16 %v300_v7, %v299_v1  ;;  %v473_v14 = vpack.c.bf16 %v308_v8, %v307_v2  ;;  %v290_v21 = vmul.f32 %v667_v27, %v267_v4  ;;  %v260_v22 = vmax.f32 %v218_v15, 0.0 }
  0xf3   :  { %v268_v23 = vmax.f32 %v250_v17, 0.0  ;;  %v280_v24 = vmul.f32 %v667_v27, %v257_v11  ;;  %v288_v25 = vmul.f32 %v667_v27, %v265_v12  ;;  %v258_v26 = vmax.f32 %v210_v18, 0.0 }
  0xf4   :  { %454 = vst [vmem:[%s747_s5] sm:$0xff] %v453_v13   ;;  %493 = vst [vmem:[%s747_s5 + $0x20] sm:$0xff] %v473_v14   ;;  %v266_v16 = vmax.f32 %v242_v19, 0.0  ;;  %v283_v28 = vmul.f32 %v667_v27, %v260_v22  ;;  %v305_v32 = vadd.f32 %v676_v38, %v282_v20  ;;  %v313_v33 = vadd.f32 %v676_v38, %v290_v21 }
  0xf5   :  { %v291_v29 = vmul.f32 %v667_v27, %v268_v23  ;;  %v281_v30 = vmul.f32 %v667_v27, %v258_v26  ;;  %v303_v36 = vadd.f32 %v676_v38, %v280_v24  ;;  %v311_v37 = vadd.f32 %v676_v38, %v288_v25 }
  0xf6   :  { %v289_v31 = vmul.f32 %v667_v27, %v266_v16  ;;  %v306_v34 = vadd.f32 %v676_v38, %v283_v28 }
  0xf7   :  { %v314_v35 = vadd.f32 %v676_v38, %v291_v29  ;;  %v304_v39 = vadd.f32 %v676_v38, %v281_v30 }
  0xf8   :  { %v312_v40 = vadd.f32 %v676_v38, %v289_v31  ;;  %v468_v41 = vpack.c.bf16 %v306_v34, %v305_v32 }
  0xf9   :  { %v488_v42 = vpack.c.bf16 %v314_v35, %v313_v33  ;;  %v463_v43 = vpack.c.bf16 %v304_v39, %v303_v36 }
  0xfa   :  { %v483_v27 = vpack.c.bf16 %v312_v40, %v311_v37  ;;  %492 = vst [vmem:[%s747_s5 + $0x18] sm:$0xff] %v468_v41  }
  0xfb   :  { %496 = vst [vmem:[%s747_s5 + $0x38] sm:$0xff] %v488_v42   ;;  %491 = vst [vmem:[%s747_s5 + $0x10] sm:$0xff] %v463_v43  }
  0xfc   :  { %495 = vst [vmem:[%s747_s5 + $0x30] sm:$0xff] %v483_v27  }

// kernel: drug_gcn_forward.9
= control target key start
LH: loop header
LB: loop body
LE: loop exit
PB: predicated region body
PF: predicated region fallthrough
CT: control target
= control target key end

     0   :  { %s583_s1 = inlined_call_operand.vmem [shape: bf16[128,128], index: 1, kind: input, shape index: {}]   ;;  %s584_s0 = inlined_call_operand.vmem [shape: bf16[128,128], index: 0, kind: input, shape index: {}]   ;;  %s585_s2 = inlined_call_operand.vmem [shape: bf16[128,128], index: 2, kind: output, shape index: {}]  }
   0x1   :  { %v480_v0 = vld [vmem:[%s583_s1 + $0x38] sm:$0xff]   ;;  %v481_v1 = vld [vmem:[%s583_s1 + $0x30] sm:$0xff]   ;;  %v482_v2 = vld [vmem:[%s583_s1 + $0x28] sm:$0xff]  }
   0x2   :  { %432 = vmatprep.subr.bf16.mxu0 %v480_v0  ;;  %464 = vmatprep.subr.bf16.mxu1 %v480_v0  ;;  %v483_v3 = vld [vmem:[%s583_s1 + $0x20] sm:$0xff]   ;;  %v484_v6 = vld [vmem:[%s583_s1 + $0x18] sm:$0xff]   ;;  %v485_v7 = vld [vmem:[%s583_s1 + $0x10] sm:$0xff]  }
   0x3   :  { %433 = vmatpush3.bf16.msra.mxu0 %v480_v0  ;;  %472 = vmatpush3.bf16.msra.mxu1 %v480_v0  ;;  %v488_v4 = vld [vmem:[%s584_s0] sm:$0xff]   ;;  %v486_v8 = vld [vmem:[%s583_s1 + $0x8] sm:$0xff]   ;;  %v492_v12 = vld [vmem:[%s584_s0 + $0x10] sm:$0xff]  }
   0x4   :  { %434 = vmatprep.subr.bf16.mxu0 %v481_v1  ;;  %465 = vmatprep.subr.bf16.mxu1 %v481_v1  ;;  %v489_v5 = vld [vmem:[%s584_s0 + $0x20] sm:$0xff]   ;;  %v490_v10 = vld [vmem:[%s584_s0 + $0x8] sm:$0xff]   ;;  %v493_v13 = vld [vmem:[%s584_s0 + $0x30] sm:$0xff]  }
   0x5   :  { %448 = vmatprep.mubr.bf16.mxu0 %v488_v4  ;;  %456 = vmatprep.mubr.bf16.mxu1 %v489_v5  ;;  %v487_v9 = vld [vmem:[%s583_s1] sm:$0xff]   ;;  %v491_v11 = vld [vmem:[%s584_s0 + $0x28] sm:$0xff]   ;;  %v494_v14 = vld [vmem:[%s584_s0 + $0x18] sm:$0xff]  }
   0x6   :  { %v495_v15 = vld [vmem:[%s584_s0 + $0x38] sm:$0xff]  }
   0x7   :  { %435 = vmatpush3.bf16.msra.mxu0 %v481_v1  ;;  %473 = vmatpush3.bf16.msra.mxu1 %v481_v1 }
   0x8   :  { %436 = vmatprep.subr.bf16.mxu0 %v482_v2  ;;  %466 = vmatprep.subr.bf16.mxu1 %v482_v2 }
   0xb   :  { %437 = vmatpush3.bf16.msra.mxu0 %v482_v2  ;;  %474 = vmatpush3.bf16.msra.mxu1 %v482_v2 }
   0xc   :  { %438 = vmatprep.subr.bf16.mxu0 %v483_v3  ;;  %467 = vmatprep.subr.bf16.mxu1 %v483_v3 }
   0xf   :  { %439 = vmatpush3.bf16.msra.mxu0 %v483_v3  ;;  %475 = vmatpush3.bf16.msra.mxu1 %v483_v3 }
  0x10   :  { %440 = vmatprep.subr.bf16.mxu0 %v484_v6  ;;  %468 = vmatprep.subr.bf16.mxu1 %v484_v6 }
  0x13   :  { %441 = vmatpush3.bf16.msra.mxu0 %v484_v6  ;;  %476 = vmatpush3.bf16.msra.mxu1 %v484_v6 }
  0x14   :  { %442 = vmatprep.subr.bf16.mxu0 %v485_v7  ;;  %469 = vmatprep.subr.bf16.mxu1 %v485_v7 }
  0x17   :  { %443 = vmatpush3.bf16.msra.mxu0 %v485_v7  ;;  %477 = vmatpush3.bf16.msra.mxu1 %v485_v7 }
  0x18   :  { %444 = vmatprep.subr.bf16.mxu0 %v486_v8  ;;  %470 = vmatprep.subr.bf16.mxu1 %v486_v8 }
  0x1b   :  { %445 = vmatpush3.bf16.msra.mxu0 %v486_v8  ;;  %478 = vmatpush3.bf16.msra.mxu1 %v486_v8 }
  0x1c   :  { %446 = vmatprep.subr.bf16.mxu0 %v487_v9  ;;  %471 = vmatprep.subr.bf16.mxu1 %v487_v9 }
  0x1f   :  { %447 = vmatpush3.bf16.msra.mxu0 %v487_v9  ;;  %479 = vmatpush3.bf16.msra.mxu1 %v487_v9 }
  0x22   :  { %449 = vmatmul.mubr.bf16.vlgmr.msra.gmra.mxu0 %v490_v10  ;;  %457 = vmatmul.mubr.bf16.vlgmr.msra.gmra.mxu1 %v491_v11 }
  0x23   :  { %452 = vmatprep.mubr.bf16.mxu0 %v492_v12  ;;  %460 = vmatprep.mubr.bf16.mxu1 %v493_v13 }
  0x2a   :  { %453 = vmatmul.mubr.bf16.gmra.mxu0 %v494_v14  ;;  %461 = vmatmul.mubr.bf16.gmra.mxu1 %v495_v15 }
  0xe2   :  { %v450_v16 = vpop.f32.mrf.mxu0  ;;  %v458_v17 = vpop.f32.mrf.mxu1 }
  0xe4   :  { %v174_v18 = vpop.f32.mrf.mxu0  ;;  %v206_v19 = vpop.f32.mrf.mxu1 }
  0xe6   :  { %v451_v20 = vpop.f32.mrf.mxu0  ;;  %v459_v21 = vpop.f32.mrf.mxu1 }
  0xe7   :  { %v377_v22 = vpack.c.bf16 %v451_v20, %v450_v16  ;;  %v397_v23 = vpack.c.bf16 %v459_v21, %v458_v17 }
  0xe8   :  { %v177_v24 = vpop.f32.mrf.mxu0  ;;  %v209_v25 = vpop.f32.mrf.mxu1 }
  0xe9   :  { %409 = vst [vmem:[%s585_s2 + $0x8] sm:$0xff] %v377_v22   ;;  %413 = vst [vmem:[%s585_s2 + $0x28] sm:$0xff] %v397_v23   ;;  %v372_v26 = vpack.c.bf16 %v177_v24, %v174_v18  ;;  %v392_v27 = vpack.c.bf16 %v209_v25, %v206_v19 }
  0xea   :  { %v454_v28 = vpop.f32.mrf.mxu0  ;;  %v462_v29 = vpop.f32.mrf.mxu1 }
  0xeb   :  { %373 = vst [vmem:[%s585_s2] sm:$0xff] %v372_v26   ;;  %412 = vst [vmem:[%s585_s2 + $0x20] sm:$0xff] %v392_v27  }
  0xec   :  { %v190_v30 = vpop.f32.mrf.mxu0  ;;  %v222_v31 = vpop.f32.mrf.mxu1 }
  0xee   :  { %v455_v32 = vpop.f32.mrf.mxu0  ;;  %v463_v33 = vpop.f32.mrf.mxu1 }
  0xef   :  { %v387_v34 = vpack.c.bf16 %v455_v32, %v454_v28  ;;  %v407_v35 = vpack.c.bf16 %v463_v33, %v462_v29 }
  0xf0   :  { %v193_v36 = vpop.f32.mrf.mxu0  ;;  %v225_v37 = vpop.f32.mrf.mxu1 }
  0xf1   :  { %411 = vst [vmem:[%s585_s2 + $0x18] sm:$0xff] %v387_v34   ;;  %415 = vst [vmem:[%s585_s2 + $0x38] sm:$0xff] %v407_v35   ;;  %v382_v38 = vpack.c.bf16 %v193_v36, %v190_v30  ;;  %v402_v39 = vpack.c.bf16 %v225_v37, %v222_v31 }
  0xf3   :  { %410 = vst [vmem:[%s585_s2 + $0x10] sm:$0xff] %v382_v38   ;;  %414 = vst [vmem:[%s585_s2 + $0x30] sm:$0xff] %v402_v39  }

// kernel: drug_gcn_forward.7
= control target key start
LH: loop header
LB: loop body
LE: loop exit
PB: predicated region body
PF: predicated region fallthrough
CT: control target
= control target key end

     0   :  { %7 = vsyncpa [#allocation3], 0  ;;  %s623_s0 = inlined_call_operand.hbm [shape: bf16[128,128], index: 0, kind: input, shape index: {}]   ;;  %s624_s1 = inlined_call_operand.hbm [shape: bf16[128,128], index: 1, kind: input, shape index: {}]   ;;  %s625_s2 = inlined_call_operand.vmem [shape: bf16[128,128], index: 2, kind: output, shape index: {}]  }
   0x1   :  { %8 = vsyncpa [#allocation5], 0  ;;  %s574_s9 = smov [#allocation2]  }
   0x2   :  { %s14_s10 = sshll.u32 %s574_s9, 4  ;;  %s15_s10 = int_to_ptr.vmem [resolvable:$true] %s14_s10 }
   0x3   :  { %s538_s11 = scalar_lea.vmem %s15_s10, 1024  ;;  %p543_p1 = scmp.lt.s32.totalorder %s15_s10, %s15_s10 }
   0x4   :  { %p539_p0 = scmp.ne.s32.totalorder %s15_s10, %s538_s11  ;;  %p544_p2 = scmp.lt.s32.totalorder %s538_s11, %s538_s11 }
   0x6   :  { %p545_p3 = por %p544_p2, %p543_p1 }
   0x8   :  { %p546_p4 = pnand %p545_p3, %p539_p0 }
   0xa   :  { %549 = shalt.err (!%p546_p4)
}
   0xb   :  { %s575_s12 = smov 64   ;;  %s576_s13 = smov 4  }
   0xc   :  { %20 = dma.hbm_to_vmem [thread:$0]  %s623_s0, 1024, %s15_s10, [#allocation3], %s575_s12, %s575_s12, %s576_s13  }
   0xd   :  { %s577_s16 = smov [#allocation4]  }
   0xe   :  { %s26_s17 = sshll.u32 %s577_s16, 4  ;;  %s27_s17 = int_to_ptr.vmem [resolvable:$true] %s26_s17 }
   0xf   :  { %s558_s18 = scalar_lea.vmem %s27_s17, 1024  ;;  %p563_p6 = scmp.lt.s32.totalorder %s27_s17, %s27_s17 }
  0x10   :  { %p559_p5 = scmp.ne.s32.totalorder %s27_s17, %s558_s18  ;;  %p564_p7 = scmp.lt.s32.totalorder %s558_s18, %s558_s18 }
  0x12   :  { %p565_p8 = por %p564_p7, %p563_p6 }
  0x14   :  { %p566_p9 = pnand %p565_p8, %p559_p5 }
  0x16   :  { %569 = shalt.err (!%p566_p9)
}
  0x17   :  { %32 = dma.hbm_to_vmem [thread:$0]  %s624_s1, 1024, %s27_s17, [#allocation5], %s575_s12, %s575_s12, %s576_s13  }
  0x18   :  { %570 = dma.done.wait [#allocation3], 1024  }
  0x19   :  { %571 = vsyncadd [#allocation3], 4294966272 }
  0x1a   :  { %572 = dma.done.wait [#allocation5], 1024  }
  0x1b   :  { %573 = vsyncadd [#allocation5], 4294966272  ;;  %v514_v0 = vld [vmem:[#allocation4 + $0x38] sm:$0xff]   ;;  %v515_v1 = vld [vmem:[#allocation4 + $0x30] sm:$0xff]  }
  0x1c   :  { %462 = vmatprep.subr.bf16.mxu0 %v514_v0  ;;  %494 = vmatprep.subr.bf16.mxu1 %v514_v0  ;;  %v516_v2 = vld [vmem:[#allocation4 + $0x28] sm:$0xff]   ;;  %v517_v3 = vld [vmem:[#allocation4 + $0x20] sm:$0xff]   ;;  %v518_v6 = vld [vmem:[#allocation4 + $0x18] sm:$0xff]  }
  0x1d   :  { %463 = vmatpush3.bf16.msra.mxu0 %v514_v0  ;;  %502 = vmatpush3.bf16.msra.mxu1 %v514_v0  ;;  %v522_v4 = vld [vmem:[#allocation2] sm:$0xff]   ;;  %v519_v7 = vld [vmem:[#allocation4 + $0x10] sm:$0xff]   ;;  %v520_v8 = vld [vmem:[#allocation4 + $0x8] sm:$0xff]  }
  0x1e   :  { %464 = vmatprep.subr.bf16.mxu0 %v515_v1  ;;  %495 = vmatprep.subr.bf16.mxu1 %v515_v1  ;;  %v523_v5 = vld [vmem:[#allocation2 + $0x20] sm:$0xff]   ;;  %v524_v10 = vld [vmem:[#allocation2 + $0x8] sm:$0xff]   ;;  %v526_v12 = vld [vmem:[#allocation2 + $0x10] sm:$0xff]  }
  0x1f   :  { %478 = vmatprep.mubr.bf16.mxu0 %v522_v4  ;;  %486 = vmatprep.mubr.bf16.mxu1 %v523_v5  ;;  %v521_v9 = vld [vmem:[#allocation4] sm:$0xff]   ;;  %v525_v11 = vld [vmem:[#allocation2 + $0x28] sm:$0xff]   ;;  %v527_v13 = vld [vmem:[#allocation2 + $0x30] sm:$0xff]  }
  0x20   :  { %v528_v14 = vld [vmem:[#allocation2 + $0x18] sm:$0xff]  }
  0x21   :  { %465 = vmatpush3.bf16.msra.mxu0 %v515_v1  ;;  %503 = vmatpush3.bf16.msra.mxu1 %v515_v1  ;;  %v529_v15 = vld [vmem:[#allocation2 + $0x38] sm:$0xff]  }
  0x22   :  { %466 = vmatprep.subr.bf16.mxu0 %v516_v2  ;;  %496 = vmatprep.subr.bf16.mxu1 %v516_v2 }
  0x25   :  { %467 = vmatpush3.bf16.msra.mxu0 %v516_v2  ;;  %504 = vmatpush3.bf16.msra.mxu1 %v516_v2 }
  0x26   :  { %468 = vmatprep.subr.bf16.mxu0 %v517_v3  ;;  %497 = vmatprep.subr.bf16.mxu1 %v517_v3 }
  0x29   :  { %469 = vmatpush3.bf16.msra.mxu0 %v517_v3  ;;  %505 = vmatpush3.bf16.msra.mxu1 %v517_v3 }
  0x2a   :  { %470 = vmatprep.subr.bf16.mxu0 %v518_v6  ;;  %498 = vmatprep.subr.bf16.mxu1 %v518_v6 }
  0x2d   :  { %471 = vmatpush3.bf16.msra.mxu0 %v518_v6  ;;  %506 = vmatpush3.bf16.msra.mxu1 %v518_v6 }
  0x2e   :  { %472 = vmatprep.subr.bf16.mxu0 %v519_v7  ;;  %499 = vmatprep.subr.bf16.mxu1 %v519_v7 }
  0x31   :  { %473 = vmatpush3.bf16.msra.mxu0 %v519_v7  ;;  %507 = vmatpush3.bf16.msra.mxu1 %v519_v7 }
  0x32   :  { %474 = vmatprep.subr.bf16.mxu0 %v520_v8  ;;  %500 = vmatprep.subr.bf16.mxu1 %v520_v8 }
  0x35   :  { %475 = vmatpush3.bf16.msra.mxu0 %v520_v8  ;;  %508 = vmatpush3.bf16.msra.mxu1 %v520_v8 }
  0x36   :  { %476 = vmatprep.subr.bf16.mxu0 %v521_v9  ;;  %501 = vmatprep.subr.bf16.mxu1 %v521_v9 }
  0x39   :  { %477 = vmatpush3.bf16.msra.mxu0 %v521_v9  ;;  %509 = vmatpush3.bf16.msra.mxu1 %v521_v9 }
  0x3c   :  { %479 = vmatmul.mubr.bf16.vlgmr.msra.gmra.mxu0 %v524_v10  ;;  %487 = vmatmul.mubr.bf16.vlgmr.msra.gmra.mxu1 %v525_v11 }
  0x3d   :  { %482 = vmatprep.mubr.bf16.mxu0 %v526_v12  ;;  %490 = vmatprep.mubr.bf16.mxu1 %v527_v13 }
  0x44   :  { %483 = vmatmul.mubr.bf16.gmra.mxu0 %v528_v14  ;;  %491 = vmatmul.mubr.bf16.gmra.mxu1 %v529_v15 }
  0xfc   :  { %v480_v16 = vpop.f32.mrf.mxu0  ;;  %v488_v17 = vpop.f32.mrf.mxu1 }
  0xfe   :  { %v202_v18 = vpop.f32.mrf.mxu0  ;;  %v234_v19 = vpop.f32.mrf.mxu1 }
 0x100   :  { %v481_v20 = vpop.f32.mrf.mxu0  ;;  %v489_v21 = vpop.f32.mrf.mxu1 }
 0x101   :  { %v407_v22 = vpack.c.bf16 %v481_v20, %v480_v16  ;;  %v427_v23 = vpack.c.bf16 %v489_v21, %v488_v17 }
 0x102   :  { %v205_v24 = vpop.f32.mrf.mxu0  ;;  %v237_v25 = vpop.f32.mrf.mxu1 }
 0x103   :  { %439 = vst [vmem:[%s625_s2 + $0x8] sm:$0xff] %v407_v22   ;;  %443 = vst [vmem:[%s625_s2 + $0x28] sm:$0xff] %v427_v23   ;;  %v402_v26 = vpack.c.bf16 %v205_v24, %v202_v18  ;;  %v422_v27 = vpack.c.bf16 %v237_v25, %v234_v19 }
 0x104   :  { %v484_v28 = vpop.f32.mrf.mxu0  ;;  %v492_v29 = vpop.f32.mrf.mxu1 }
 0x105   :  { %403 = vst [vmem:[%s625_s2] sm:$0xff] %v402_v26   ;;  %442 = vst [vmem:[%s625_s2 + $0x20] sm:$0xff] %v422_v27  }
 0x106   :  { %v218_v30 = vpop.f32.mrf.mxu0  ;;  %v250_v31 = vpop.f32.mrf.mxu1 }
 0x108   :  { %v485_v32 = vpop.f32.mrf.mxu0  ;;  %v493_v33 = vpop.f32.mrf.mxu1 }
 0x109   :  { %v417_v34 = vpack.c.bf16 %v485_v32, %v484_v28  ;;  %v437_v35 = vpack.c.bf16 %v493_v33, %v492_v29 }
 0x10a   :  { %v221_v36 = vpop.f32.mrf.mxu0  ;;  %v253_v37 = vpop.f32.mrf.mxu1 }
 0x10b   :  { %441 = vst [vmem:[%s625_s2 + $0x18] sm:$0xff] %v417_v34   ;;  %445 = vst [vmem:[%s625_s2 + $0x38] sm:$0xff] %v437_v35   ;;  %v412_v38 = vpack.c.bf16 %v221_v36, %v218_v30  ;;  %v432_v39 = vpack.c.bf16 %v253_v37, %v250_v31 }
 0x10d   :  { %440 = vst [vmem:[%s625_s2 + $0x10] sm:$0xff] %v412_v38   ;;  %444 = vst [vmem:[%s625_s2 + $0x30] sm:$0xff] %v432_v39  }
 0x10e   :  { %349 = vsyncpa [#allocation3], 1 }
 0x10f   :  { %350 = vsyncpa [#allocation5], 1 }

</bundles_post_ra>
